<compile_context>
chip_gen: v7x
topology: tpu7x:2x2x1
jax: 0.10.0
libtpu: 0.0.40
codegen_flags: <defaults>
</compile_context>

<pallas_src>
import jax
import jax.numpy as jnp
from jax.experimental import pallas as pl
from jax.experimental.pallas import tpu as pltpu


def _round_up(x, m):
    return (x + m - 1) // m * m


def rec_model_kernel(x_ref, w1_ref, b1_ref, w2_ref, b2_ref, o_ref):
    """One batch tile of sigmoid(relu(x @ W1 + b1) @ w2 + b2), lane-dense out.

    x_ref : (TB, D_in) f32   streamed tile
    w1_ref: (D_in, H)  bf16  VMEM-resident
    b1_ref: (1, H)     f32   VMEM-resident
    w2_ref: (8, H)     bf16  row 0 = real weights, rows 1..7 zero
    b2_ref: (1, 1)     f32   SMEM scalar
    o_ref : (1, TB)    f32   lane-dense output slab
    """
    # Layer 1 on the MXU: bf16 operands, f32 accumulation.  K=210 (unaligned)
    # is masked by Mosaic.
    x = x_ref[...].astype(jnp.bfloat16)
    h = jnp.dot(x, w1_ref[...], preferred_element_type=jnp.float32)
    h = jnp.maximum(h + b1_ref[...], 0.0)                      # (TB, H) f32

    # Layer 2 (H -> 1) as rhs-transposed matmul so batch lands on lanes:
    # (8, H) . (TB, H)^T -> (8, TB).  bf16 halves the XLU/vreg traffic of the
    # transposed operand.
    y = jax.lax.dot_general(
        w2_ref[...], h.astype(jnp.bfloat16),
        dimension_numbers=(((1,), (1,)), ((), ())),
        preferred_element_type=jnp.float32)                    # (8, TB) f32

    logits = y[0:1, :] + b2_ref[0, 0]                          # (1, TB)
    # Numerically stable sigmoid, computed on the EUP (tanh), no divide.
    o_ref[...] = (0.5 * (jnp.tanh(0.5 * logits) + 1.0)).astype(o_ref.dtype)


def _choose_tile(batch, block_batch):
    """Pick the batch tile: lane-aligned, >= ~8 grid steps for large batches."""
    if batch <= 128:
        return batch                       # single full-array tile
    tb = _round_up(pl.cdiv(batch, 8), 128)  # keep >= ~8 grid steps (megacore/pipeline)
    tb = min(tb, _round_up(block_batch, 128))
    return max(tb, 128)


def rec_model_forward(x, w1, b1, w2, b2, *, block_batch=8192):
    """x: (B, D_in) float32 -> (B, 1) float32."""
    B, D_in = x.shape
    H = w1.shape[1]
    assert w1.shape == (D_in, H)
    assert b1.shape == (1, H)
    assert w2.shape == (H, 1)
    assert b2.shape == (1, 1)

    TB = _choose_tile(B, block_batch)
    grid_b = pl.cdiv(B, TB)

    # Tiny, VMEM-resident parameters (cheap to convert once per call).
    w1_p = w1.astype(jnp.bfloat16)                               # (D_in, H)
    b1_p = b1.astype(jnp.float32)                                # (1, H)
    # w2 as an (8, H) row matrix (row 0 real, rows 1..7 zero): full sublane tile.
    w2_p = jnp.pad(w2.astype(jnp.float32).T, ((0, 7), (0, 0))).astype(jnp.bfloat16)
    b2_p = b2.astype(jnp.float32)                                # (1, 1) SMEM

    out = pl.pallas_call(
        rec_model_kernel,
        out_shape=jax.ShapeDtypeStruct((1, B), jnp.float32),
        grid=(grid_b,),
        in_specs=[
            pl.BlockSpec((TB, D_in), lambda i: (i, 0)),          # x: streamed f32 tiles
            pl.BlockSpec((D_in, H), lambda i: (0, 0)),           # W1: VMEM-resident
            pl.BlockSpec((1, H), lambda i: (0, 0)),              # b1: VMEM-resident
            pl.BlockSpec((8, H), lambda i: (0, 0)),              # w2: VMEM-resident
            pl.BlockSpec(memory_space=pltpu.MemorySpace.SMEM),   # b2: SMEM scalar
        ],
        out_specs=pl.BlockSpec((1, TB), lambda i: (0, i)),       # lane-dense output
        compiler_params=pltpu.CompilerParams(
            dimension_semantics=("parallel",),
            vmem_limit_bytes=64 * 1024 * 1024,                   # big tiles on v5e; <= v7x physical
        ),
    )(x, w1_p, b1_p, w2_p, b2_p)

    return out.reshape(B, 1)


def init_params(key, input_size=210, h_dim=(128,)):
    """Deterministic init mimicking nn.Linear's uniform(-1/sqrt(fan_in), ...)."""
    k1, k2, k3, k4 = jax.random.split(key, 4)
    h0 = h_dim[0]
    lim1 = 1.0 / jnp.sqrt(jnp.float32(input_size))
    lim2 = 1.0 / jnp.sqrt(jnp.float32(h_dim[-1]))
    # Stored as (in_features, out_features) for x @ W.
    w1 = jax.random.uniform(k1, (input_size, h0), jnp.float32, -lim1, lim1)
    b1 = jax.random.uniform(k2, (1, h0), jnp.float32, -lim1, lim1)
    w2 = jax.random.uniform(k3, (h_dim[-1], 1), jnp.float32, -lim2, lim2)
    b2 = jax.random.uniform(k4, (1, 1), jnp.float32, -lim2, lim2)
    return w1, b1, w2, b2


def rec_model_ref(x, w1, b1, w2, b2):
    """Pure-JAX reference of the PyTorch forward (f32), for sanity checking."""
    h = jnp.maximum(x @ w1 + b1, 0.0)
    return jax.nn.sigmoid(h @ w2 + b2)


if __name__ == "__main__":
    key = jax.random.PRNGKey(0)
    k_params, k_x1, k_x2 = jax.random.split(key, 3)

    input_size = 210
    h_dim = (128,)
    w1, b1, w2, b2 = init_params(k_params, input_size, h_dim)

    # Small single-tile test (B < 128 -> full-array block, grid=1).
    batch = 8
    x = jax.random.normal(k_x1, (batch, input_size), jnp.float32)
    out = jax.block_until_ready(rec_model_forward(x, w1, b1, w2, b2))
    ref = rec_model_ref(x, w1, b1, w2, b2)
    assert out.shape == (batch, 1)
    # bf16 compute (f32 accumulation) -> loosened tolerance.
    assert jnp.allclose(out, ref, atol=1e-2), float(jnp.max(jnp.abs(out - ref)))

    # Multi-tile test (grid > 1, ragged last tile handled by edge masking).
    batch2 = 300
    x2 = jax.random.normal(k_x2, (batch2, input_size), jnp.float32)
    out2 = jax.block_until_ready(rec_model_forward(x2, w1, b1, w2, b2))
    ref2 = rec_model_ref(x2, w1, b1, w2, b2)
    assert out2.shape == (batch2, 1)
    assert jnp.allclose(out2, ref2, atol=1e-2), float(jnp.max(jnp.abs(out2 - ref2)))

    print("KERNEL_OK")
</pallas_src>

<mosaic_0001>
module attributes {stable_mosaic.version = 11 : i64} {
  func.func @rec_model_kernel(%arg0: i32, %arg1: memref<8x210xf32, #tpu.memory_space<vmem>>, %arg2: memref<210x128xbf16, #tpu.memory_space<vmem>>, %arg3: memref<1x128xf32, #tpu.memory_space<vmem>>, %arg4: memref<8x128xbf16, #tpu.memory_space<vmem>>, %arg5: memref<1x1xf32, #tpu.memory_space<smem>>, %arg6: memref<1x8xf32, #tpu.memory_space<vmem>>) attributes {dimension_semantics = [#tpu.dimension_semantics<parallel>], iteration_bounds = array<i64: 1>, scalar_prefetch = 0 : i64, scratch_operands = 0 : i64, tpu.core_type = #tpu.core_type<tc>, window_params = [{transform_indices = @transform_0, window_bounds = array<i64: 8, 210>}, {pipeline_mode = #tpu.pipeline_mode<synchronous>, transform_indices = @transform_1, window_bounds = array<i64: 210, 128>}, {pipeline_mode = #tpu.pipeline_mode<synchronous>, transform_indices = @transform_2, window_bounds = array<i64: 1, 128>}, {pipeline_mode = #tpu.pipeline_mode<synchronous>, transform_indices = @transform_3, window_bounds = array<i64: 8, 128>}, {transform_indices = @transform_4, window_bounds = array<i64: 1, 1>}, {transform_indices = @transform_5, window_bounds = array<i64: 1, 8>}]} {
    %c0 = arith.constant 0 : index
    %c0_0 = arith.constant 0 : index
    %0 = vector.load %arg1[%c0, %c0_0] : memref<8x210xf32, #tpu.memory_space<vmem>>, vector<8x210xf32>
    %1 = arith.truncf %0 : vector<8x210xf32> to vector<8x210xbf16>
    %c0_1 = arith.constant 0 : index
    %c0_2 = arith.constant 0 : index
    %2 = vector.load %arg2[%c0_1, %c0_2] : memref<210x128xbf16, #tpu.memory_space<vmem>>, vector<210x128xbf16>
    %cst = arith.constant dense<0.000000e+00> : vector<8x128xf32>
    %3 = tpu.matmul %1, %2, %cst {dimension_numbers = #tpu.dot_dimension_numbers<[1], [0], [0], [1], [0, 0, 1, 1], [], []>} : vector<8x210xbf16>, vector<210x128xbf16>, vector<8x128xf32> -> vector<8x128xf32>
    %c0_3 = arith.constant 0 : index
    %c0_4 = arith.constant 0 : index
    %4 = vector.load %arg3[%c0_3, %c0_4] : memref<1x128xf32, #tpu.memory_space<vmem>>, vector<1x128xf32>
    %5 = vector.broadcast %4 : vector<1x128xf32> to vector<8x128xf32>
    %6 = arith.addf %3, %5 : vector<8x128xf32>
    %cst_5 = arith.constant 0.000000e+00 : f32
    %7 = vector.broadcast %cst_5 : f32 to vector<8x128xf32>
    %8 = arith.maximumf %6, %7 : vector<8x128xf32>
    %c0_6 = arith.constant 0 : index
    %c0_7 = arith.constant 0 : index
    %9 = vector.load %arg4[%c0_6, %c0_7] : memref<8x128xbf16, #tpu.memory_space<vmem>>, vector<8x128xbf16>
    %10 = arith.truncf %8 : vector<8x128xf32> to vector<8x128xbf16>
    %cst_8 = arith.constant dense<0.000000e+00> : vector<8x8xf32>
    %11 = tpu.matmul %9, %10, %cst_8 {dimension_numbers = #tpu.dot_dimension_numbers<[1], [1], [0], [0], [0, 0, 1, 0], [], []>} : vector<8x128xbf16>, vector<8x128xbf16>, vector<8x8xf32> -> vector<8x8xf32>
    %12 = vector.extract_strided_slice %11 {offsets = [0, 0], sizes = [1, 8], strides = [1, 1]} : vector<8x8xf32> to vector<1x8xf32>
    %c0_9 = arith.constant 0 : index
    %c0_10 = arith.constant 0 : index
    %13 = memref.load %arg5[%c0_9, %c0_10] : memref<1x1xf32, #tpu.memory_space<smem>>
    %14 = vector.broadcast %13 : f32 to vector<1x8xf32>
    %15 = arith.addf %12, %14 : vector<1x8xf32>
    %cst_11 = arith.constant 5.000000e-01 : f32
    %16 = vector.broadcast %cst_11 : f32 to vector<1x8xf32>
    %17 = arith.mulf %16, %15 : vector<1x8xf32>
    %18 = math.tanh %17 : vector<1x8xf32>
    %cst_12 = arith.constant 1.000000e+00 : f32
    %19 = vector.broadcast %cst_12 : f32 to vector<1x8xf32>
    %20 = arith.addf %18, %19 : vector<1x8xf32>
    %cst_13 = arith.constant 5.000000e-01 : f32
    %21 = vector.broadcast %cst_13 : f32 to vector<1x8xf32>
    %22 = arith.mulf %21, %20 : vector<1x8xf32>
    %c0_14 = arith.constant 0 : index
    %c0_15 = arith.constant 0 : index
    %23 = vector.load %arg6[%c0_14, %c0_15] : memref<1x8xf32, #tpu.memory_space<vmem>>, vector<1x8xf32>
    tpu.vector_store %arg6[%c0_14, %c0_15], %22 {strides = array<i32>} : memref<1x8xf32, #tpu.memory_space<vmem>>, vector<1x8xf32>,
    return
  }
  func.func @transform_0(%arg0: i32) -> (i32, i32) {
    %c0_i32 = arith.constant 0 : i32
    %c0_i32_0 = arith.constant 0 : i32
    return %arg0, %c0_i32 : i32, i32
  }
  func.func @transform_1(%arg0: i32) -> (i32, i32) {
    %c0_i32 = arith.constant 0 : i32
    %c0_i32_0 = arith.constant 0 : i32
    %c0_i32_1 = arith.constant 0 : i32
    return %c0_i32, %c0_i32_0 : i32, i32
  }
  func.func @transform_2(%arg0: i32) -> (i32, i32) {
    %c0_i32 = arith.constant 0 : i32
    %c0_i32_0 = arith.constant 0 : i32
    %c0_i32_1 = arith.constant 0 : i32
    return %c0_i32, %c0_i32_0 : i32, i32
  }
  func.func @transform_3(%arg0: i32) -> (i32, i32) {
    %c0_i32 = arith.constant 0 : i32
    %c0_i32_0 = arith.constant 0 : i32
    %c0_i32_1 = arith.constant 0 : i32
    return %c0_i32, %c0_i32_0 : i32, i32
  }
  func.func @transform_4(%arg0: i32) -> (i32, i32) {
    %c0_i32 = arith.constant 0 : i32
    %c0_i32_0 = arith.constant 0 : i32
    %c0_i32_1 = arith.constant 0 : i32
    return %c0_i32, %c0_i32_0 : i32, i32
  }
  func.func @transform_5(%arg0: i32) -> (i32, i32) {
    %c0_i32 = arith.constant 0 : i32
    %c0_i32_0 = arith.constant 0 : i32
    return %c0_i32, %arg0 : i32, i32
  }
}

</mosaic_0001>

<bundles_post_ra>
// kernel: tpu_custom_call.1
= control target key start
LH: loop header
LB: loop body
LE: loop exit
PB: predicated region body
PF: predicated region fallthrough
CT: control target
= control target key end

     0   :  { %11 = vsyncpa [#allocation4], 0  ;;  %s579_s0 = inlined_call_operand.hbm [shape: f32[8,210], index: 0, kind: input, shape index: {}]   ;;  %s580_s1 = inlined_call_operand.hbm [shape: bf16[210,128], index: 1, kind: input, shape index: {}]   ;;  %s581_s2 = inlined_call_operand.hbm [shape: f32[1,128], index: 2, kind: input, shape index: {}]   ;;  %s582_s3 = inlined_call_operand.hbm [shape: bf16[8,128], index: 3, kind: input, shape index: {}]   ;;  %s583_s4 = inlined_call_operand.<no memory space> [shape: f32[1,1], index: 4, kind: input, shape index: {}]   ;;  %s584_s5 = inlined_call_operand.hbm [shape: f32[1,8], index: 5, kind: output, shape index: {}]  }
   0x1   :  { %12 = vsyncpa [#allocation7], 0 }
   0x2   :  { %13 = vsyncpa [#allocation10], 0 }
   0x3   :  { %14 = vsyncpa [#allocation5], 0  ;;  %s476_s18 = smov [#allocation6]   ;;  %s358_s22 = scalar_lea.hbm %s580_s1, 1728 }
   0x4   :  { %s30_s19 = sshll.u32 %s476_s18, 4  ;;  %p359_p0 = scmp.ne.s32.totalorder %s580_s1, %s358_s22  ;;  %s31_s19 = int_to_ptr.vmem [resolvable:$true] %s30_s19 }
   0x5   :  { %p362_p1 = scmp.lt.u32.totalorder %s358_s22, %s580_s1 }
   0x7   :  { %p364_p2 = pnand %p362_p1, %p359_p0 }
   0x9   :  { %367 = shalt.err (!%p364_p2)
}
   0xa   :  { %s368_s27 = scalar_lea.vmem %s31_s19, 1728  ;;  %p373_p4 = scmp.lt.s32.totalorder %s31_s19, %s31_s19 }
   0xb   :  { %p369_p3 = scmp.ne.s32.totalorder %s31_s19, %s368_s27  ;;  %p374_p5 = scmp.lt.s32.totalorder %s368_s27, %s368_s27 }
   0xd   :  { %p375_p6 = por %p374_p5, %p373_p4 }
   0xf   :  { %p376_p7 = pnand %p375_p6, %p369_p3 }
  0x11   :  { %379 = shalt.err (!%p376_p7)
}
  0x12   :  { %s477_s28 = smov 64   ;;  %s478_s29 = smov 4  }
  0x13   :  { %36 = dma.hbm_to_vmem [thread:$0]  %s580_s1, 1728, %s31_s19, [#allocation7], %s477_s28, %s477_s28, %s478_s29  }
  0x14   :  { %s479_s7 = smov [#allocation3]   ;;  %s480_s9 = smov [#allocation8]  }
  0x15   :  { %s21_s8 = sshll.u32 %s479_s7, 4  ;;  %s43_s10 = sshll.u32 %s480_s9, 4  ;;  %s22_s8 = int_to_ptr.vmem [resolvable:$true] %s21_s8  ;;  %s44_s10 = int_to_ptr.vmem [resolvable:$true] %s43_s10 }
  0x16   :  { %s380_s13 = scalar_lea.hbm %s579_s0, 256 }
  0x17   :  { %p381_p8 = scmp.ne.s32.totalorder %s579_s0, %s380_s13  ;;  %p384_p9 = scmp.lt.u32.totalorder %s380_s13, %s579_s0 }
  0x19   :  { %p386_p10 = pnand %p384_p9, %p381_p8 }
  0x1b   :  { %389 = shalt.err (!%p386_p10)
}
  0x1c   :  { %s390_s1 = scalar_lea.vmem %s22_s8, 256  ;;  %p395_p12 = scmp.lt.s32.totalorder %s22_s8, %s22_s8 }
  0x1d   :  { %p391_p11 = scmp.ne.s32.totalorder %s22_s8, %s390_s1  ;;  %p396_p13 = scmp.lt.s32.totalorder %s390_s1, %s390_s1 }
  0x1f   :  { %p397_p0 = por %p396_p13, %p395_p12 }
  0x21   :  { %p398_p1 = pnand %p397_p0, %p391_p11 }
  0x23   :  { %401 = shalt.err (!%p398_p1)
}
  0x24   :  { %24 = dma.hbm_to_vmem [thread:$0]  %s579_s0, 256, %s22_s8, [#allocation4]  }
  0x25   :  { %s402_s22 = scalar_lea.hbm %s581_s2, 16 }
  0x26   :  { %p403_p2 = scmp.ne.s32.totalorder %s581_s2, %s402_s22  ;;  %p406_p3 = scmp.lt.u32.totalorder %s402_s22, %s581_s2 }
  0x28   :  { %p408_p4 = pnand %p406_p3, %p403_p2 }
  0x2a   :  { %411 = shalt.err (!%p408_p4)
}
  0x2b   :  { %s412_s27 = scalar_lea.vmem %s44_s10, 16  ;;  %s416_s28 = scalar_lea.vmem %s44_s10, 32 }
  0x2c   :  { %p413_p5 = scmp.ne.s32.totalorder %s44_s10, %s412_s27  ;;  %p417_p6 = scmp.lt.s32.totalorder %s44_s10, %s44_s10 }
  0x2d   :  { %p418_p7 = scmp.lt.s32.totalorder %s416_s28, %s412_s27 }
  0x2f   :  { %p419_p8 = por %p418_p7, %p417_p6 }
  0x31   :  { %p420_p9 = pnand %p419_p8, %p413_p5 }
  0x33   :  { %423 = shalt.err (!%p420_p9)
}
  0x34   :  { %46 = dma.hbm_to_vmem [thread:$0]  %s581_s2, 16, %s44_s10, [#allocation7]  }
  0x35   :  { %s481_s30 = smov [#allocation9]   ;;  %s424_s9 = scalar_lea.hbm %s582_s3, 64 }
  0x36   :  { %s53_s6 = sshll.u32 %s481_s30, 4  ;;  %p425_p10 = scmp.ne.s32.totalorder %s582_s3, %s424_s9  ;;  %s54_s6 = int_to_ptr.vmem [resolvable:$true] %s53_s6 }
  0x37   :  { %p428_p11 = scmp.lt.u32.totalorder %s424_s9, %s582_s3 }
  0x39   :  { %p430_p12 = pnand %p428_p11, %p425_p10 }
  0x3b   :  { %433 = shalt.err (!%p430_p12)
}
  0x3c   :  { %s434_s15 = scalar_lea.vmem %s54_s6, 64  ;;  %p439_p0 = scmp.lt.s32.totalorder %s54_s6, %s54_s6 }
  0x3d   :  { %p435_p13 = scmp.ne.s32.totalorder %s54_s6, %s434_s15  ;;  %p440_p1 = scmp.lt.s32.totalorder %s434_s15, %s434_s15 }
  0x3f   :  { %p441_p2 = por %p440_p1, %p439_p0 }
  0x41   :  { %p442_p3 = pnand %p441_p2, %p435_p13 }
  0x43   :  { %445 = shalt.err (!%p442_p3)
}
  0x44   :  { %56 = dma.hbm_to_vmem [thread:$0]  %s582_s3, 64, %s54_s6, [#allocation10]  }
  0x45   :  { %468 = dma.done.wait [#allocation4], 256  }
  0x46   :  { %469 = vsyncadd [#allocation4], 4294967040 }
  0x47   :  { %470 = dma.done.wait [#allocation7], 1744  }
  0x48   :  { %471 = vsyncadd [#allocation7], 4294965552 }
  0x49   :  { %472 = dma.done.wait [#allocation10], 64  }
  0x4a   :  { %473 = vsyncadd [#allocation10], 4294967232  ;;  %v482_v0 = vmov 0   ;;  %v342_v1 = vld [vmem:[#allocation6] sm:$0xff]   ;;  %v343_v2 = vld [vmem:[#allocation6 + $0x8] sm:$0xff]   ;;  %vm191_vm0 = vcmask 670720   ;;  %v283_v30 = vstv %s583_s4 }
  0x4b   :  { %199 = vmatprep.subr.bf16.mxu0 %v482_v0  ;;  %v344_v3 = vld [vmem:[#allocation6 + $0x10] sm:$0xff]   ;;  %v345_v4 = vld [vmem:[#allocation6 + $0x18] sm:$0xff]   ;;  %v346_v6 = vld [vmem:[#allocation6 + $0x20] sm:$0xff]   ;;  %vm195_vm1 = vcmask 1040384   ;;  %v483_v20 = vmov 0.0   ;;  %vm484_vm2 = vmmov 0  }
  0x4c   :  { %200 = vmatpush1.bf16.msra.mxu0 %v342_v1  ;;  %v73_v5 = vld [vmem:[#allocation3 + $0x8] sm:$0xff]  ;;  %v347_v8 = vld [vmem:[#allocation6 + $0x28] sm:$0xff]   ;;  %v348_v9 = vld [vmem:[#allocation6 + $0x30] sm:$0xff]   ;;  %326 = vmatprep.subr.bf16.mxu1 %v483_v20  ;;  %s485_s17 = smov [#allocation11]   ;;  %vm289_vm3 = vcmask 57344  }
  0x4d   :  { %201 = vmatprep.subr.bf16.mxu0 %v482_v0  ;;  %v75_v7 = vpack.c.bf16 %v73_v5, %v73_v5  ;;  %v349_v10 = vld [vmem:[#allocation6 + $0x38] sm:$0xff]   ;;  %v350_v11 = vld [vmem:[#allocation6 + $0x40] sm:$0xff]   ;;  %v351_v12 = vld [vmem:[#allocation6 + $0x48] sm:$0xff]   ;;  %328 = vmatprep.mubr.msk.bf16.mxu1 %vm484_vm2, %v483_v20  ;;  %s297_s1 = sshll.u32 %s485_s17, 4  ;;  %s298_s1 = int_to_ptr.vmem [resolvable:$true] %s297_s1 }
  0x4e   :  { %v352_v13 = vld [vmem:[#allocation6 + $0x50] sm:$0xff]   ;;  %v353_v14 = vld [vmem:[#allocation6 + $0x58] sm:$0xff]   ;;  %v354_v15 = vld [vmem:[#allocation6 + $0x60] sm:$0xff]   ;;  %s446_s18 = scalar_lea.vmem %s298_s1, 16  ;;  %s450_s19 = scalar_lea.vmem %s298_s1, 32 }
  0x4f   :  { %323 = vmatprep.mubr.msk.bf16.mxu0 %vm191_vm0, %v75_v7  ;;  %v355_v16 = vld [vmem:[#allocation6 + $0x68] ss:$0 sps:$4 sm:$0x11]   ;;  %v72_v17 = vld [vmem:[#allocation3] sm:$0xff]  ;;  %v308_v21 = vld [vmem:[#allocation8] ss:$0 sm:$0xff]  ;;  %p447_p4 = scmp.ne.s32.totalorder %s298_s1, %s446_s18  ;;  %p451_p5 = scmp.lt.s32.totalorder %s298_s1, %s298_s1 }
  0x50   :  { %202 = vmatpush1.bf16.msra.mxu0 %v343_v2  ;;  %v197_v18 = vsel %vm195_vm1, %v355_v16, 0  ;;  %v74_v19 = vpack.c.bf16 %v72_v17, %v72_v17  ;;  %v240_v29 = vld [vmem:[#allocation9] sm:$0xf]  ;;  %p452_p6 = scmp.lt.s32.totalorder %s450_s19, %s446_s18 }
  0x51   :  { %203 = vmatprep.subr.bf16.mxu0 %v482_v0 }
  0x52   :  { %p453_p7 = por %p452_p6, %p451_p5 }
  0x54   :  { %204 = vmatpush1.bf16.msra.mxu0 %v344_v3  ;;  %p454_p8 = pnand %p453_p7, %p447_p4 }
  0x55   :  { %205 = vmatprep.subr.bf16.mxu0 %v482_v0 }
  0x58   :  { %206 = vmatpush1.bf16.msra.mxu0 %v345_v4 }
  0x59   :  { %207 = vmatprep.subr.bf16.mxu0 %v482_v0 }
  0x5c   :  { %208 = vmatpush1.bf16.msra.mxu0 %v346_v6 }
  0x5d   :  { %209 = vmatprep.subr.bf16.mxu0 %v482_v0 }
  0x60   :  { %210 = vmatpush1.bf16.msra.mxu0 %v347_v8 }
  0x61   :  { %211 = vmatprep.subr.bf16.mxu0 %v482_v0 }
  0x64   :  { %212 = vmatpush1.bf16.msra.mxu0 %v348_v9 }
  0x65   :  { %213 = vmatprep.subr.bf16.mxu0 %v482_v0 }
  0x68   :  { %214 = vmatpush1.bf16.msra.mxu0 %v349_v10 }
  0x69   :  { %215 = vmatprep.subr.bf16.mxu0 %v482_v0 }
  0x6c   :  { %216 = vmatpush1.bf16.msra.mxu0 %v350_v11 }
  0x6d   :  { %217 = vmatprep.subr.bf16.mxu0 %v482_v0 }
  0x70   :  { %218 = vmatpush1.bf16.msra.mxu0 %v351_v12 }
  0x71   :  { %219 = vmatprep.subr.bf16.mxu0 %v482_v0 }
  0x74   :  { %220 = vmatpush1.bf16.msra.mxu0 %v352_v13 }
  0x75   :  { %221 = vmatprep.subr.bf16.mxu0 %v482_v0 }
  0x78   :  { %222 = vmatpush1.bf16.msra.mxu0 %v353_v14 }
  0x79   :  { %223 = vmatprep.subr.bf16.mxu0 %v482_v0 }
  0x7c   :  { %224 = vmatpush1.bf16.msra.mxu0 %v354_v15 }
  0x7d   :  { %225 = vmatprep.subr.bf16.mxu0 %v482_v0 }
  0x80   :  { %226 = vmatpush1.bf16.msra.mxu0 %v197_v18 }
  0x83   :  { %232 = vmatmul.mubr.bf16.vlgmr.msra.gmra.mrb[0].mxu0 %v74_v19 }
 0x156   :  { %v233_v22 = vpop.f32.mrb[0].mxu0 }
 0x157   :  { %v234_v23 = vadd.f32 %v308_v21, %v233_v22  ;;  %v235_v24 = vpop.f32.mrb[1].mxu0 }
 0x158   :  { %v236_v25 = vpop.f32.mrb[2].mxu0 }
 0x159   :  { %v239_v26 = vmax.f32 %v234_v23, 0.0  ;;  %v237_v27 = vpop.f32.mrb[3].mxu0 }
 0x15b   :  { %v241_v28 = vpack.c.bf16 %v239_v26, %v239_v26 }
 0x15d   :  { %327 = vmatpush3.bf16.xpose.msra.mxu1 %v241_v28 }
 0x164   :  { %329 = vmatmul.mubr.bf16.vlgmr.msra.gmra.mrb[0].mxu1 %v240_v29 }
 0x237   :  { %v276_v31 = vpop.f32.mrb[0].mxu1 }
 0x238   :  { %v284_v32 = vadd.f32 %v283_v30, %v276_v31  ;;  %v330_v33 = vpop.f32.mrb[1].mxu1 }
 0x239   :  { %v279_v34 = vpop.f32.mrb[2].mxu1 }
 0x23a   :  { %v285_v35 = vmul.f32 0.5, %v284_v32  ;;  %v331_v36 = vpop.f32.mrb[3].mxu1 }
 0x23c   :  { %356 = vtanh.f32 %v285_v35 }
 0x246   :  { %v357_v37 = vpop.eup %356 }
 0x247   :  { %v287_v38 = vadd.f32 1.0, %v357_v37 }
 0x249   :  { %v288_v39 = vmul.f32 0.5, %v287_v38 }
 0x24b   :  { %290 = vst.msk [vmem:[#allocation11] sm:$0x1] %vm289_vm3, %v288_v39 }
 0x24c   :  { %457 = shalt.err (!%p454_p8)
}
 0x24d   :  { %s458_s21 = scalar_lea.hbm %s584_s5, 16 }
 0x24e   :  { %p459_p9 = scmp.ne.s32.totalorder %s584_s5, %s458_s21  ;;  %p462_p10 = scmp.lt.u32.totalorder %s458_s21, %s584_s5 }
 0x250   :  { %p464_p11 = pnand %p462_p10, %p459_p9 }
 0x252   :  { %467 = shalt.err (!%p464_p11)
}
 0x253   :  { %300 = dma.vmem_to_hbm [thread:$0]  %s298_s1, 16, %s584_s5, [#allocation5]  }
 0x254   :  { %474 = dma.done.wait [#allocation5], 16  }
 0x255   :  { %475 = vsyncadd [#allocation5], 4294967280 }
 0x256   :  { %304 = vsyncpa [#allocation4], 1 }
 0x257   :  { %305 = vsyncpa [#allocation7], 1 }
 0x258   :  { %306 = vsyncpa [#allocation10], 1 }
 0x259   :  { %307 = vsyncpa [#allocation5], 1 }

</bundles_post_ra>
